<compile_context>
chip_gen: v6e
topology: v6e:2x2x1
jax: 0.10.0
libtpu: 0.0.40
codegen_flags: <defaults>
</compile_context>

<pallas_src>
import math

import jax
import jax.numpy as jnp
from jax import lax
from jax.experimental import pallas as pl
from jax.experimental.pallas import tpu as pltpu


def concat_linear_kernel(time_ref, x_ref, freq_ref, phase_ref,
                         w1_ref, b1_ref, w3_ref, w23_ref, b23_ref, o_ref):
    # --- SinusoidalPosEmb: one transcendental, no concatenate ---
    # freq = [f, f], phase = [0, pi/2]  =>  sin(t*f) first half, cos(t*f) second half.
    emb = jnp.sin(time_ref[...] * freq_ref[...] + phase_ref[...])     # (TB, dim_emb)

    # --- time_mlp first Linear + exact (erf) GELU ---
    h = jnp.dot(emb, w1_ref[...], preferred_element_type=jnp.float32) + b1_ref[...]
    h = 0.5 * h * (1.0 + lax.erf(h * (1.0 / math.sqrt(2.0))))

    # --- folded tail: (x + h@w2 + b2) @ w3 + b3 == x@w3 + h@(w2@w3) + (b2@w3 + b3)
    # x@w3 is independent of h, so the scheduler can overlap it with the chain.
    out = (jnp.dot(x_ref[...], w3_ref[...], preferred_element_type=jnp.float32)
           + jnp.dot(h, w23_ref[...], preferred_element_type=jnp.float32)
           + b23_ref[...])
    o_ref[...] = out.astype(o_ref.dtype)


def _round_up(v, m):
    return ((v + m - 1) // m) * m


def prepare_params(params, *, dim_emb):
    """One-time (per parameter set) host-side preparation: sinusoid tables, folded
    tail weights, 2-D biases.  Keep the result and reuse it across forward calls."""
    w1, b1, w2, b2, w3, b3 = params
    half_dim = dim_emb // 2
    # NOTE: dim_emb assumed even, half_dim >= 2 (same (half_dim - 1) divisor as PyTorch).
    f = jnp.exp(jnp.arange(half_dim, dtype=jnp.float32)
                * (-math.log(10000.0) / (half_dim - 1)))
    freq = jnp.concatenate([f, f]).reshape(1, dim_emb).astype(jnp.float32)
    phase = jnp.concatenate(
        [jnp.zeros((half_dim,), jnp.float32),
         jnp.full((half_dim,), 0.5 * math.pi, jnp.float32)]).reshape(1, dim_emb)

    w23 = (w2 @ w3).astype(jnp.float32)                        # (dim_emb, dim_out)
    b23 = (b2 @ w3 + b3).reshape(1, -1).astype(jnp.float32)    # (1, dim_out)
    return {
        "freq": freq, "phase": phase,
        "w1": w1.astype(jnp.float32), "b1": b1.reshape(1, dim_emb).astype(jnp.float32),
        "w3": w3.astype(jnp.float32), "w23": w23, "b23": b23,
    }


def concat_linear(x, time, prep, *, tb_cap=2048):
    """x: (B, dim_in) f32, time: (B,) f32, prep: prepare_params(...) -> (B, dim_out)."""
    B, dim_in = x.shape
    dim_emb = prep["w1"].shape[0]
    dim_out = prep["w3"].shape[1]

    # Batch tile: multiple of 8 sublanes, large cap to amortize per-step overhead.
    TB = min(_round_up(B, 8), tb_cap)
    # Ensure >= 2 grid steps when B allows, so v7x megacore can shard the batch
    # (one extra ~0.35 us step is negligible on single-TC v5e/v6e).
    if pl.cdiv(B, TB) < 2 and B > 8:
        TB = _round_up(pl.cdiv(B, 2), 8)
    grid = (pl.cdiv(B, TB),)

    time2d = time.reshape(B, 1).astype(jnp.float32)
    x = x.astype(jnp.float32)

    row = lambda shape: pl.BlockSpec(shape, lambda i: (i, 0))
    rep = lambda a: pl.BlockSpec(a.shape, lambda i: (0, 0))      # resident weights

    cost = pl.CostEstimate(
        flops=2 * B * (dim_in * dim_out + dim_emb * dim_emb + dim_emb * dim_out),
        transcendentals=2 * B * dim_emb,  # sin + erf
        bytes_accessed=4 * (B * (dim_in + dim_out + 1)
                            + dim_emb * dim_emb + dim_in * dim_out
                            + dim_emb * dim_out + 3 * dim_emb + dim_out),
    )

    out = pl.pallas_call(
        concat_linear_kernel,
        out_shape=jax.ShapeDtypeStruct((B, dim_out), jnp.float32),
        grid=grid,
        in_specs=[row((TB, 1)), row((TB, dim_in)),
                  rep(prep["freq"]), rep(prep["phase"]),
                  rep(prep["w1"]), rep(prep["b1"]),
                  rep(prep["w3"]), rep(prep["w23"]), rep(prep["b23"])],
        out_specs=pl.BlockSpec((TB, dim_out), lambda i: (i, 0)),
        compiler_params=pltpu.CompilerParams(
            dimension_semantics=("parallel",)),
        cost_estimate=cost,
    )(time2d, x, prep["freq"], prep["phase"],
      prep["w1"], prep["b1"], prep["w3"], prep["w23"], prep["b23"])
    return out


def init_params(key, dim_in, dim_out, dim_emb):
    """Deterministic init mimicking nn.Linear's uniform(-1/sqrt(fan_in), ...).
    Weights are stored as (in_features, out_features)."""
    ks = jax.random.split(key, 6)

    def lin(kw, kb, fan_in, fan_out):
        bound = 1.0 / math.sqrt(fan_in)
        w = jax.random.uniform(kw, (fan_in, fan_out), jnp.float32, -bound, bound)
        b = jax.random.uniform(kb, (fan_out,), jnp.float32, -bound, bound)
        return w, b

    w1, b1 = lin(ks[0], ks[1], dim_emb, dim_emb)   # Linear(dim_emb, dim_emb)
    w2, b2 = lin(ks[2], ks[3], dim_emb, dim_in)    # Linear(dim_emb, dim_in)
    w3, b3 = lin(ks[4], ks[5], dim_in, dim_out)    # Linear(dim_in, dim_out)
    return (w1, b1, w2, b2, w3, b3)


def reference(x, time, params, dim_emb):
    """Pure-JAX reference mirroring the PyTorch forward."""
    w1, b1, w2, b2, w3, b3 = params
    half_dim = dim_emb // 2
    freqs = jnp.exp(jnp.arange(half_dim, dtype=jnp.float32) *
                    (-math.log(10000.0) / (half_dim - 1)))
    emb = time[:, None] * freqs[None, :]
    emb = jnp.concatenate([jnp.sin(emb), jnp.cos(emb)], axis=1)
    h = emb @ w1 + b1
    h = 0.5 * h * (1.0 + lax.erf(h / math.sqrt(2.0)))
    t = h @ w2 + b2
    return (x + t) @ w3 + b3


if __name__ == "__main__":
    dim_in, dim_out, dim_emb = 32, 64, 32

    key = jax.random.PRNGKey(0)
    kx, kt, kp, kx2, kt2 = jax.random.split(key, 5)
    params = init_params(kp, dim_in, dim_out, dim_emb)
    prep = prepare_params(params, dim_emb=dim_emb)   # hoisted: once per param set

    # Small case (B = 8): single grid step.
    B = 8
    x = jax.random.normal(kx, (B, dim_in), jnp.float32)
    time = jax.random.uniform(kt, (B,), jnp.float32, 0.0, 100.0)
    out = jax.block_until_ready(concat_linear(x, time, prep))
    ref = reference(x, time, params, dim_emb)
    assert out.shape == (B, dim_out)
    assert jnp.allclose(out, ref, atol=1e-4, rtol=1e-4), "mismatch vs reference (B=8)"

    # Larger case (B = 300): two grid steps, ragged last block (masked stores).
    B2 = 300
    x2 = jax.random.normal(kx2, (B2, dim_in), jnp.float32)
    time2 = jax.random.uniform(kt2, (B2,), jnp.float32, 0.0, 100.0)
    out2 = jax.block_until_ready(concat_linear(x2, time2, prep))
    ref2 = reference(x2, time2, params, dim_emb)
    assert out2.shape == (B2, dim_out)
    assert jnp.allclose(out2, ref2, atol=1e-4, rtol=1e-4), "mismatch vs reference (B=300)"

    print("KERNEL_OK")
</pallas_src>

<mosaic_0001>
module attributes {stable_mosaic.version = 11 : i64} {
  func.func @concat_linear_kernel(%arg0: i32, %arg1: memref<8x1xf32, #tpu.memory_space<vmem>>, %arg2: memref<8x32xf32, #tpu.memory_space<vmem>>, %arg3: memref<1x32xf32, #tpu.memory_space<vmem>>, %arg4: memref<1x32xf32, #tpu.memory_space<vmem>>, %arg5: memref<32x32xf32, #tpu.memory_space<vmem>>, %arg6: memref<1x32xf32, #tpu.memory_space<vmem>>, %arg7: memref<32x64xf32, #tpu.memory_space<vmem>>, %arg8: memref<32x64xf32, #tpu.memory_space<vmem>>, %arg9: memref<1x64xf32, #tpu.memory_space<vmem>>, %arg10: memref<8x64xf32, #tpu.memory_space<vmem>>) attributes {dimension_semantics = [#tpu.dimension_semantics<parallel>], iteration_bounds = array<i64: 1>, scalar_prefetch = 0 : i64, scratch_operands = 0 : i64, tpu.core_type = #tpu.core_type<tc>, window_params = [{transform_indices = @transform_0, window_bounds = array<i64: 8, 1>}, {transform_indices = @transform_1, window_bounds = array<i64: 8, 32>}, {pipeline_mode = #tpu.pipeline_mode<synchronous>, transform_indices = @transform_2, window_bounds = array<i64: 1, 32>}, {pipeline_mode = #tpu.pipeline_mode<synchronous>, transform_indices = @transform_3, window_bounds = array<i64: 1, 32>}, {pipeline_mode = #tpu.pipeline_mode<synchronous>, transform_indices = @transform_4, window_bounds = array<i64: 32, 32>}, {pipeline_mode = #tpu.pipeline_mode<synchronous>, transform_indices = @transform_5, window_bounds = array<i64: 1, 32>}, {pipeline_mode = #tpu.pipeline_mode<synchronous>, transform_indices = @transform_6, window_bounds = array<i64: 32, 64>}, {pipeline_mode = #tpu.pipeline_mode<synchronous>, transform_indices = @transform_7, window_bounds = array<i64: 32, 64>}, {pipeline_mode = #tpu.pipeline_mode<synchronous>, transform_indices = @transform_8, window_bounds = array<i64: 1, 64>}, {transform_indices = @transform_9, window_bounds = array<i64: 8, 64>}]} {
    %c0 = arith.constant 0 : index
    %c0_0 = arith.constant 0 : index
    %0 = vector.load %arg1[%c0, %c0_0] : memref<8x1xf32, #tpu.memory_space<vmem>>, vector<8x1xf32>
    %c0_1 = arith.constant 0 : index
    %c0_2 = arith.constant 0 : index
    %1 = vector.load %arg3[%c0_1, %c0_2] : memref<1x32xf32, #tpu.memory_space<vmem>>, vector<1x32xf32>
    %2 = vector.broadcast %0 : vector<8x1xf32> to vector<8x32xf32>
    %3 = vector.broadcast %1 : vector<1x32xf32> to vector<8x32xf32>
    %4 = arith.mulf %2, %3 : vector<8x32xf32>
    %c0_3 = arith.constant 0 : index
    %c0_4 = arith.constant 0 : index
    %5 = vector.load %arg4[%c0_3, %c0_4] : memref<1x32xf32, #tpu.memory_space<vmem>>, vector<1x32xf32>
    %6 = vector.broadcast %5 : vector<1x32xf32> to vector<8x32xf32>
    %7 = arith.addf %4, %6 : vector<8x32xf32>
    %8 = math.sin %7 : vector<8x32xf32>
    %c0_5 = arith.constant 0 : index
    %c0_6 = arith.constant 0 : index
    %9 = vector.load %arg5[%c0_5, %c0_6] : memref<32x32xf32, #tpu.memory_space<vmem>>, vector<32x32xf32>
    %cst = arith.constant dense<0.000000e+00> : vector<8x32xf32>
    %10 = tpu.matmul %8, %9, %cst {dimension_numbers = #tpu.dot_dimension_numbers<[1], [0], [0], [1], [0, 0, 1, 1], [], []>} : vector<8x32xf32>, vector<32x32xf32>, vector<8x32xf32> -> vector<8x32xf32>
    %c0_7 = arith.constant 0 : index
    %c0_8 = arith.constant 0 : index
    %11 = vector.load %arg6[%c0_7, %c0_8] : memref<1x32xf32, #tpu.memory_space<vmem>>, vector<1x32xf32>
    %12 = vector.broadcast %11 : vector<1x32xf32> to vector<8x32xf32>
    %13 = arith.addf %10, %12 : vector<8x32xf32>
    %cst_9 = arith.constant 5.000000e-01 : f32
    %14 = vector.broadcast %cst_9 : f32 to vector<8x32xf32>
    %15 = arith.mulf %14, %13 : vector<8x32xf32>
    %cst_10 = arith.constant 0.707106769 : f32
    %16 = vector.broadcast %cst_10 : f32 to vector<8x32xf32>
    %17 = arith.mulf %13, %16 : vector<8x32xf32>
    %18 = math.erf %17 : vector<8x32xf32>
    %cst_11 = arith.constant 1.000000e+00 : f32
    %19 = vector.broadcast %cst_11 : f32 to vector<8x32xf32>
    %20 = arith.addf %19, %18 : vector<8x32xf32>
    %21 = arith.mulf %15, %20 : vector<8x32xf32>
    %c0_12 = arith.constant 0 : index
    %c0_13 = arith.constant 0 : index
    %22 = vector.load %arg2[%c0_12, %c0_13] : memref<8x32xf32, #tpu.memory_space<vmem>>, vector<8x32xf32>
    %c0_14 = arith.constant 0 : index
    %c0_15 = arith.constant 0 : index
    %23 = vector.load %arg7[%c0_14, %c0_15] : memref<32x64xf32, #tpu.memory_space<vmem>>, vector<32x64xf32>
    %cst_16 = arith.constant dense<0.000000e+00> : vector<8x64xf32>
    %24 = tpu.matmul %22, %23, %cst_16 {dimension_numbers = #tpu.dot_dimension_numbers<[1], [0], [0], [1], [0, 0, 1, 1], [], []>} : vector<8x32xf32>, vector<32x64xf32>, vector<8x64xf32> -> vector<8x64xf32>
    %c0_17 = arith.constant 0 : index
    %c0_18 = arith.constant 0 : index
    %25 = vector.load %arg8[%c0_17, %c0_18] : memref<32x64xf32, #tpu.memory_space<vmem>>, vector<32x64xf32>
    %cst_19 = arith.constant dense<0.000000e+00> : vector<8x64xf32>
    %26 = tpu.matmul %21, %25, %cst_19 {dimension_numbers = #tpu.dot_dimension_numbers<[1], [0], [0], [1], [0, 0, 1, 1], [], []>} : vector<8x32xf32>, vector<32x64xf32>, vector<8x64xf32> -> vector<8x64xf32>
    %27 = arith.addf %24, %26 : vector<8x64xf32>
    %c0_20 = arith.constant 0 : index
    %c0_21 = arith.constant 0 : index
    %28 = vector.load %arg9[%c0_20, %c0_21] : memref<1x64xf32, #tpu.memory_space<vmem>>, vector<1x64xf32>
    %29 = vector.broadcast %28 : vector<1x64xf32> to vector<8x64xf32>
    %30 = arith.addf %27, %29 : vector<8x64xf32>
    %c0_22 = arith.constant 0 : index
    %c0_23 = arith.constant 0 : index
    %31 = vector.load %arg10[%c0_22, %c0_23] : memref<8x64xf32, #tpu.memory_space<vmem>>, vector<8x64xf32>
    tpu.vector_store %arg10[%c0_22, %c0_23], %30 {strides = array<i32>} : memref<8x64xf32, #tpu.memory_space<vmem>>, vector<8x64xf32>,
    return
  }
  func.func @transform_0(%arg0: i32) -> (i32, i32) {
    %c0_i32 = arith.constant 0 : i32
    %c0_i32_0 = arith.constant 0 : i32
    return %arg0, %c0_i32 : i32, i32
  }
  func.func @transform_1(%arg0: i32) -> (i32, i32) {
    %c0_i32 = arith.constant 0 : i32
    %c0_i32_0 = arith.constant 0 : i32
    return %arg0, %c0_i32 : i32, i32
  }
  func.func @transform_2(%arg0: i32) -> (i32, i32) {
    %c0_i32 = arith.constant 0 : i32
    %c0_i32_0 = arith.constant 0 : i32
    %c0_i32_1 = arith.constant 0 : i32
    return %c0_i32, %c0_i32_0 : i32, i32
  }
  func.func @transform_3(%arg0: i32) -> (i32, i32) {
    %c0_i32 = arith.constant 0 : i32
    %c0_i32_0 = arith.constant 0 : i32
    %c0_i32_1 = arith.constant 0 : i32
    return %c0_i32, %c0_i32_0 : i32, i32
  }
  func.func @transform_4(%arg0: i32) -> (i32, i32) {
    %c0_i32 = arith.constant 0 : i32
    %c0_i32_0 = arith.constant 0 : i32
    %c0_i32_1 = arith.constant 0 : i32
    return %c0_i32, %c0_i32_0 : i32, i32
  }
  func.func @transform_5(%arg0: i32) -> (i32, i32) {
    %c0_i32 = arith.constant 0 : i32
    %c0_i32_0 = arith.constant 0 : i32
    %c0_i32_1 = arith.constant 0 : i32
    return %c0_i32, %c0_i32_0 : i32, i32
  }
  func.func @transform_6(%arg0: i32) -> (i32, i32) {
    %c0_i32 = arith.constant 0 : i32
    %c0_i32_0 = arith.constant 0 : i32
    %c0_i32_1 = arith.constant 0 : i32
    return %c0_i32, %c0_i32_0 : i32, i32
  }
  func.func @transform_7(%arg0: i32) -> (i32, i32) {
    %c0_i32 = arith.constant 0 : i32
    %c0_i32_0 = arith.constant 0 : i32
    %c0_i32_1 = arith.constant 0 : i32
    return %c0_i32, %c0_i32_0 : i32, i32
  }
  func.func @transform_8(%arg0: i32) -> (i32, i32) {
    %c0_i32 = arith.constant 0 : i32
    %c0_i32_0 = arith.constant 0 : i32
    %c0_i32_1 = arith.constant 0 : i32
    return %c0_i32, %c0_i32_0 : i32, i32
  }
  func.func @transform_9(%arg0: i32) -> (i32, i32) {
    %c0_i32 = arith.constant 0 : i32
    %c0_i32_0 = arith.constant 0 : i32
    return %arg0, %c0_i32 : i32, i32
  }
}

</mosaic_0001>

<bundles_post_ra>
// kernel: tpu_custom_call.1
= control target key start
LH: loop header
LB: loop body
LE: loop exit
PB: predicated region body
PF: predicated region fallthrough
CT: control target
= control target key end

     0   :  { %14 = vsyncpa [#allocation3], 0  ;;  %s779_s0 = inlined_call_operand.vmem [shape: f32[8,1], index: 0, kind: input, shape index: {}]   ;;  %s780_s1 = inlined_call_operand.vmem [shape: f32[8,32], index: 1, kind: input, shape index: {}]   ;;  %s781_s2 = inlined_call_operand.vmem [shape: f32[1,32], index: 2, kind: input, shape index: {}]   ;;  %s782_s3 = inlined_call_operand.vmem [shape: f32[1,32], index: 3, kind: input, shape index: {}]   ;;  %s783_s4 = inlined_call_operand.hbm [shape: f32[32,32], index: 4, kind: input, shape index: {}]   ;;  %s784_s5 = inlined_call_operand.vmem [shape: f32[1,32], index: 5, kind: input, shape index: {}]   ;;  %s785_s6 = inlined_call_operand.hbm [shape: f32[32,64], index: 6, kind: input, shape index: {}]   ;;  %s786_s7 = inlined_call_operand.hbm [shape: f32[32,64], index: 7, kind: input, shape index: {}]   ;;  %s787_s8 = inlined_call_operand.vmem [shape: f32[1,64], index: 8, kind: input, shape index: {}]   ;;  %s788_s9 = inlined_call_operand.hbm [shape: f32[8,64], index: 9, kind: output, shape index: {}]  }
   0x1   :  { %15 = vsyncpa [#allocation6], 0 }
   0x2   :  { %16 = vsyncpa [#allocation4], 0  ;;  %s642_s30 = smov [#allocation5]   ;;  %s643_s11 = smov [#allocation2]  }
   0x3   :  { %s44_s10 = sshll.u32 %s642_s30, 4  ;;  %s30_s12 = sshll.u32 %s643_s11, 4  ;;  %s45_s10 = int_to_ptr.vmem [resolvable:$true] %s44_s10  ;;  %s31_s12 = int_to_ptr.vmem [resolvable:$true] %s30_s12 }
   0x4   :  { %s564_s13 = scalar_lea.vmem %s45_s10, 512  ;;  %p569_p1 = scmp.lt.s32.totalorder %s45_s10, %s45_s10 }
   0x5   :  { %p565_p0 = scmp.ne.s32.totalorder %s45_s10, %s564_s13  ;;  %p570_p2 = scmp.lt.s32.totalorder %s564_s13, %s564_s13 }
   0x7   :  { %p571_p3 = por %p570_p2, %p569_p1 }
   0x9   :  { %p572_p4 = pnand %p571_p3, %p565_p0 }
   0xb   :  { %575 = shalt.err (!%p572_p4)
}
   0xc   :  { %s644_s14 = smov 128   ;;  %s645_s15 = smov 8  }
   0xd   :  { %50 = dma.hbm_to_vmem [thread:$0]  %s785_s6, 512, %s45_s10, [#allocation6], %s644_s14, %s644_s14, %s645_s15  }
   0xe   :  { %s584_s18 = scalar_lea.vmem %s31_s12, 512  ;;  %p589_p6 = scmp.lt.s32.totalorder %s31_s12, %s31_s12 }
   0xf   :  { %p585_p5 = scmp.ne.s32.totalorder %s31_s12, %s584_s18  ;;  %p590_p7 = scmp.lt.s32.totalorder %s584_s18, %s584_s18 }
  0x11   :  { %p591_p8 = por %p590_p7, %p589_p6 }
  0x13   :  { %p592_p9 = pnand %p591_p8, %p585_p5 }
  0x15   :  { %595 = shalt.err (!%p592_p9)
}
  0x16   :  { %36 = dma.hbm_to_vmem [thread:$0]  %s783_s4, 512, %s31_s12, [#allocation3], %s644_s14, %s644_s14, %s645_s15  }
  0x17   :  { %s646_s21 = smov [#allocation7]  }
  0x18   :  { %s56_s22 = sshll.u32 %s646_s21, 4  ;;  %s57_s22 = int_to_ptr.vmem [resolvable:$true] %s56_s22 }
  0x19   :  { %s604_s23 = scalar_lea.vmem %s57_s22, 512  ;;  %p609_p11 = scmp.lt.s32.totalorder %s57_s22, %s57_s22 }
  0x1a   :  { %p605_p10 = scmp.ne.s32.totalorder %s57_s22, %s604_s23  ;;  %p610_p12 = scmp.lt.s32.totalorder %s604_s23, %s604_s23 }
  0x1c   :  { %p611_p13 = por %p610_p12, %p609_p11 }
  0x1e   :  { %p612_p0 = pnand %p611_p13, %p605_p10 }
  0x20   :  { %615 = shalt.err (!%p612_p0)
}
  0x21   :  { %62 = dma.hbm_to_vmem [thread:$0]  %s786_s7, 512, %s57_s22, [#allocation6], %s644_s14, %s644_s14, %s645_s15  }
  0x22   :  { %636 = dma.done.wait [#allocation3], 512  }
  0x23   :  { %637 = vsyncadd [#allocation3], 4294966784 }
  0x24   :  { %638 = dma.done.wait [#allocation6], 1024  }
  0x25   :  { %639 = vsyncadd [#allocation6], 4294966272  ;;  %v647_v0 = vmov 0   ;;  %v74_v1 = vld [vmem:[%s779_s0] sm:$0xff]  ;;  %v203_v2 = vld [vmem:[#allocation2 + $0x18] sm:$0xff]  ;;  %v648_v3 = vmov 0.0  }
  0x26   :  { %549 = vset.pattern.permute.xlu0 %v647_v0  ;;  %497 = vmatprep.subr.mxu0 %v648_v3  ;;  %v202_v4 = vld [vmem:[#allocation2 + $0x10] sm:$0xff]  ;;  %vm649_vm0 = vmmov 0   ;;  %v201_v5 = vld [vmem:[#allocation2 + $0x8] sm:$0xff]  ;;  %v200_v6 = vld [vmem:[#allocation2] sm:$0xff]  ;;  %v650_v23 = vmov 2102212464  }
  0x27   :  { %78 = vperm.xlu0 %549, %v74_v1   ;;  %505 = vmatprep.mubr.msk.f32.mxu0 %vm649_vm0, %v648_v3  ;;  %v471_v7 = vld [vmem:[%s781_s2] ss:$0 sm:$0xff]  ;;  %v651_v25 = vmov 920167782   ;;  %v652_v29 = vmov 1326507024  }
  0x28   :  { %498 = vmatpush3.msra.mxu0 %v203_v2  ;;  %508 = vmatprep.subr.mxu1 %v648_v3  ;;  %v472_v8 = vld [vmem:[%s782_s3] ss:$0 sm:$0xff]  ;;  %v653_v31 = vmov 683565275   ;;  %v654_v33 = vmov 2475754826  }
  0x29   :  { %499 = vmatprep.subr.mxu0 %v648_v3  ;;  %516 = vmatprep.mubr.msk.f32.mxu1 %vm649_vm0, %v648_v3  ;;  %v655_v36 = vmov 2131351028   ;;  %vm211_vm13 = vcmask 261120   ;;  %s656_s10 = smov [#allocation8]   ;;  %vm453_vm15 = vcmask 523264  }
  0x2a   :  { %500 = vmatpush3.msra.mxu0 %v202_v4 }
  0x2b   :  { %501 = vmatprep.subr.mxu0 %v648_v3 }
  0x2c   :  { %502 = vmatpush3.msra.mxu0 %v201_v5 }
  0x2d   :  { %503 = vmatprep.subr.mxu0 %v648_v3 }
  0x2e   :  { %504 = vmatpush3.msra.mxu0 %v200_v6 }
  0x2f   :  { %519 = vmatprep.subr.mxu0 %v648_v3 }
  0xa2   :  { %v79_v9 = vpop.permute.xlu0 %78 }
  0xa3   :  { %v87_v10 = vmul.f32 %v471_v7, %v79_v9 }
  0xa5   :  { %v735_v11 = vadd.f32 %v472_v8, %v87_v10 }
  0xa7   :  { %v99_v12 = vand.u32 2139095040, %v735_v11  ;;  %v96_v13 = vand.u32 2147483647, %v735_v11  ;;  %vm98_vm8 = vcmp.lt.s32.totalorder %v735_v11, 0  ;;  %vm188_vm14 = vweird.f32 %v735_v11 }
  0xa9   :  { %v100_v14 = vshrl.u32 %v99_v12, 23  ;;  %v103_v16 = vand.u32 8388607, %v96_v13  ;;  %vm97_vm9 = vcmp.le.f32.partialorder %v96_v13, 0.7853982 }
  0xab   :  { %v473_v15 = vadd.s32 4294967169, %v100_v14  ;;  %v104_v19 = vor.u32 8388608, %v103_v16 }
  0xad   :  { %v106_v17 = vadd.s32 1, %v473_v15  ;;  %v144_v27 = vshll.u32 %v104_v19, 8 }
  0xaf   :  { %vm107_vm1 = vcmp.gt.s32.totalorder %v106_v17, 0 }
  0xb0   :  { %v108_v18 = vsel %vm107_vm1, %v106_v17, 0 }
  0xb1   :  { %v110_v20 = vand.u32 31, %v108_v18  ;;  %v109_v21 = vshrl.u32 %v108_v18, 5 }
  0xb3   :  { %v111_v22 = vsub.s32 32, %v110_v20  ;;  %v122_v24 = vshll.u32 %v650_v23, %v110_v20  ;;  %v125_v26 = vshll.u32 %v651_v25, %v110_v20  ;;  %v113_v32 = vshll.u32 %v653_v31, %v110_v20 }
  0xb4   :  { %v116_v35 = vshll.u32 %v654_v33, %v110_v20  ;;  %v119_v38 = vshll.u32 %v655_v36, %v110_v20  ;;  %vm131_vm2 = vcmp.lt.s32.totalorder %v109_v21, 4  ;;  %vm128_vm3 = vcmp.lt.s32.totalorder %v109_v21, 1 }
  0xb5   :  { %v123_v28 = vshrl.u32 %v651_v25, %v111_v22  ;;  %v126_v30 = vshrl.u32 %v652_v29, %v111_v22  ;;  %v114_v34 = vshrl.u32 %v654_v33, %v111_v22  ;;  %v117_v37 = vshrl.u32 %v655_v36, %v111_v22 }
  0xb6   :  { %v120_v39 = vshrl.u32 %v650_v23, %v111_v22  ;;  %v112_v43 = vshrl.u32 %v653_v31, %v111_v22  ;;  %vm129_vm4 = vcmp.lt.s32.totalorder %v109_v21, 2  ;;  %vm130_vm5 = vcmp.lt.s32.totalorder %v109_v21, 3 }
  0xb7   :  { %v124_v40 = vor.u32 %v123_v28, %v122_v24  ;;  %v127_v41 = vor.u32 %v126_v30, %v125_v26  ;;  %v115_v42 = vor.u32 %v114_v34, %v113_v32  ;;  %v118_v44 = vor.u32 %v117_v37, %v116_v35 }
  0xb8   :  { %v121_v45 = vor.u32 %v120_v39, %v119_v38 }
  0xb9   :  { %v137_v46 = vsel %vm131_vm2, %v124_v40, 920167782  ;;  %v141_v47 = vsel %vm131_vm2, %v127_v41, 1326507024  ;;  %v136_v49 = vsel %vm128_vm3, %v115_v42, %v118_v44  ;;  %v132_v52 = vsel %vm128_vm3, %v112_v43, %v115_v42  ;;  %v294_v41 = vld [vmem:[#allocation5 + $0x18] sm:$0xff]  ;;  %v293_v43 = vld [vmem:[#allocation5 + $0x10] sm:$0xff] }
  0xba   :  { %v133_v48 = vsel %vm131_vm2, %v121_v45, 2102212464  ;;  %v138_v50 = vsel %vm130_vm5, %v121_v45, %v137_v46  ;;  %v140_v51 = vsel %vm128_vm3, %v118_v44, %v121_v45  ;;  %v142_v55 = vsel %vm130_vm5, %v124_v40, %v141_v47  ;;  %v298_v42 = vld [vmem:[#allocation7 + $0x18] sm:$0xff]  ;;  %v296_v45 = vld [vmem:[#allocation7 + $0x8] sm:$0xff]  ;;  %v291_v46 = vld [vmem:[#allocation5] sm:$0xff] }
  0xbb   :  { %v134_v53 = vsel %vm130_vm5, %v118_v44, %v133_v48  ;;  %v139_v54 = vsel %vm129_vm4, %v136_v49, %v138_v50  ;;  %v143_v56 = vsel %vm129_vm4, %v140_v51, %v142_v55  ;;  %509 = vmatpush3.msra.mxu1 %v298_v42  ;;  %v292_v44 = vld [vmem:[#allocation5 + $0x8] sm:$0xff]  ;;  %v290_v47 = vld [vmem:[%s780_s1] sm:$0xff] }
  0xbc   :  { %v741_v57 = vmul.u32.u64.low %v144_v27, %v139_v54  ;;  %v742_v58 = vmul.u32.u64.high %v144_v27, %v139_v54, %v741_v57  ;;  %v744_v59 = vmul.u32.u64.low %v144_v27, %v143_v56  ;;  %v745_v60 = vmul.u32.u64.high %v144_v27, %v143_v56, %v744_v59  ;;  %510 = vmatprep.subr.mxu1 %v648_v3  ;;  %v295_v48 = vld [vmem:[#allocation7] sm:$0xff] }
  0xbd   :  { %v135_v61 = vsel %vm129_vm4, %v132_v52, %v134_v53  ;;  %v477_v49 = vld [vmem:[%s784_s5] ss:$0 sm:$0xff]  ;;  %s461_s5 = sshll.u32 %s656_s10, 4  ;;  %s462_s5 = int_to_ptr.vmem [resolvable:$true] %s461_s5 }
  0xbe   :  { %v154_v62 = vadd.s32 1, %v742_v58  ;;  %v151_v63 = vmul.u32 %v144_v27, %v135_v61  ;;  %vm153_vm6 = vc.u32 %v745_v60, %v741_v57  ;;  %v152_v14 = vadd.s32 %v741_v57, %v745_v60  ;;  %v481_v60 = vld [vmem:[%s787_s8] ss:$0 sm:$0xff]  ;;  %s616_s11 = scalar_lea.vmem %s462_s5, 128  ;;  %p621_p2 = scmp.lt.s32.totalorder %s462_s5, %s462_s5 }
  0xbf   :  { %p617_p1 = scmp.ne.s32.totalorder %s462_s5, %s616_s11  ;;  %p622_p3 = scmp.lt.s32.totalorder %s616_s11, %s616_s11 }
  0xc0   :  { %v155_v0 = vsel %vm153_vm6, %v154_v62, %v742_v58 }
  0xc1   :  { %v156_v1 = vadd.s32 %v155_v0, %v151_v63  ;;  %p623_p4 = por %p622_p3, %p621_p2 }
  0xc3   :  { %v157_v2 = vadd.s32 536870912, %v156_v1  ;;  %p624_p5 = pnand %p623_p4, %p617_p1 }
  0xc5   :  { %v158_v4 = vshrl.u32 %v157_v2, 30 }
  0xc7   :  { %v159_v5 = vshll.u32 %v158_v4, 30  ;;  %v182_v27 = vsub.s32 4, %v158_v4 }
  0xc9   :  { %v160_v6 = vsub.s32 %v156_v1, %v159_v5  ;;  %v183_v30 = vsel %vm98_vm8, %v182_v27, %v158_v4 }
  0xca   :  { %v185_v31 = vsel %vm97_vm9, 0, %v183_v30 }
  0xcb   :  { %v162_v7 = vsub.s32 0, %v160_v6  ;;  %v189_v32 = vadd.s32 3, %v185_v31 }
  0xcd   :  { %v474_v8 = vmin.u32 %v162_v7, %v160_v6  ;;  %v190_v33 = vand.u32 3, %v189_v32 }
  0xcf   :  { %v164_v9 = vclz %v474_v8  ;;  %vm195_vm10 = vcmp.eq.s32.totalorder %v190_v33, 2  ;;  %vm192_vm11 = vcmp.eq.s32.totalorder %v190_v33, 0  ;;  %vm191_vm12 = vcmp.lt.s32.totalorder %v190_v33, 2 }
  0xd1   :  { %v475_v10 = vadd.s32 4294967294, %v164_v9 }
  0xd3   :  { %vm476_vm7 = vcmp.lt.s32.totalorder %v475_v10, 0 }
  0xd4   :  { %v167_v12 = vsel %vm476_vm7, 0, %v475_v10 }
  0xd5   :  { %v168_v15 = vsub.s32 32, %v167_v12  ;;  %v172_v16 = vsub.s32 4294967266, %v167_v12  ;;  %v169_v17 = vshll.u32 %v160_v6, %v167_v12 }
  0xd7   :  { %v170_v18 = vshrl.u32 %v152_v14, %v168_v15  ;;  %v173_v19 = vadd.s32 127, %v172_v16 }
  0xd9   :  { %v171_v20 = vor.u32 %v170_v18, %v169_v17  ;;  %v174_v21 = vshll.u32 %v173_v19, 23 }
  0xdb   :  { %v175_v22 = vor.u32 4788187, %v174_v21  ;;  %v178_v24 = vcvt.s32.f32 %v171_v20 }
  0xdd   :  { %v176_v23 = vand.u32 2147483647, %v175_v22 }
  0xdf   :  { %v179_v25 = vmul.f32 %v178_v24, %v176_v23 }
  0xe1   :  { %v180_v26 = vxor.u32 2147483648, %v179_v25 }
  0xe3   :  { %v181_v28 = vsel %vm98_vm8, %v180_v26, %v179_v25 }
  0xe4   :  { %v184_v29 = vsel %vm97_vm9, %v735_v11, %v181_v28  ;;  %v297_v11 = vld [vmem:[#allocation7 + $0x10] sm:$0xff] }
  0xe5   :  { %550 = vcosq.f32 %v184_v29  ;;  %511 = vmatpush3.msra.mxu1 %v297_v11 }
  0xe6   :  { %552 = vsinq.f32 %v184_v29  ;;  %512 = vmatprep.subr.mxu1 %v648_v3 }
  0xe7   :  { %513 = vmatpush3.msra.mxu1 %v296_v45 }
  0xe8   :  { %514 = vmatprep.subr.mxu1 %v648_v3 }
  0xe9   :  { %515 = vmatpush3.msra.mxu1 %v295_v48 }
  0xf2   :  { %v551_v34 = vpop.eup %550 }
  0xf3   :  { %v553_v35 = vpop.eup %552  ;;  %v196_v36 = vxor.u32 2147483648, %v551_v34 }
  0xf4   :  { %v193_v37 = vxor.u32 2147483648, %v553_v35 }
  0xf5   :  { %v197_v38 = vsel %vm195_vm10, %v196_v36, %v553_v35 }
  0xf6   :  { %v194_v39 = vsel %vm192_vm11, %v551_v34, %v193_v37 }
  0xf7   :  { %v198_v13 = vsel %vm191_vm12, %v194_v39, %v197_v38 }
  0xf8   :  { %v199_v40 = vsel %vm188_vm14, nan, %v198_v13 }
  0xf9   :  { %506 = vmatmul.mubr.msk.f32.vlgmr.msra.gmra.mxu0 %vm211_vm13, %v199_v40 }
  0xfa   :  { %527 = vmatprep.mubr.msk.f32.mxu0 %vm649_vm0, %v648_v3  ;;  %520 = vmatpush3.msra.mxu0 %v294_v41 }
  0xfb   :  { %521 = vmatprep.subr.mxu0 %v648_v3 }
  0xfc   :  { %522 = vmatpush3.msra.mxu0 %v293_v43 }
  0xfd   :  { %523 = vmatprep.subr.mxu0 %v648_v3 }
  0xfe   :  { %524 = vmatpush3.msra.mxu0 %v292_v44 }
  0xff   :  { %525 = vmatprep.subr.mxu0 %v648_v3 }
 0x100   :  { %526 = vmatpush3.msra.mxu0 %v291_v46 }
 0x101   :  { %528 = vmatmul.mubr.msk.f32.vlgmr.msra.gmra.mxu0 %vm211_vm13, %v290_v47 }
 0x1b9   :  { %v281_v50 = vpop.f32.mrf.mxu0 }
 0x1ba   :  { %v282_v51 = vadd.f32 %v477_v49, %v281_v50 }
 0x1bb   :  { %v507_v52 = vpop.f32.mrf.mxu0 }
 0x1bc   :  { %v286_v53 = vmul.f32 0.70710677, %v282_v51  ;;  %v285_v55 = vmul.f32 0.5, %v282_v51 }
 0x1be   :  { %554 = verf.f32 %v286_v53 }
 0x1c1   :  { %v441_v58 = vpop.f32.mrf.mxu0 }
 0x1c3   :  { %v529_v3 = vpop.f32.mrf.mxu0 }
 0x1cb   :  { %v555_v54 = vpop.eup %554 }
 0x1cc   :  { %v288_v56 = vadd.f32 1.0, %v555_v54 }
 0x1ce   :  { %v289_v57 = vmul.f32 %v288_v56, %v285_v55 }
 0x1d0   :  { %517 = vmatmul.mubr.msk.f32.vlgmr.msra.gmra.mxu1 %vm211_vm13, %v289_v57 }
 0x290   :  { %v368_v59 = vpop.f32.mrf.mxu1 }
 0x291   :  { %v442_v61 = vadd.f32 %v441_v58, %v368_v59 }
 0x292   :  { %v518_v62 = vpop.f32.mrf.mxu1 }
 0x293   :  { %v452_v63 = vadd.f32 %v481_v60, %v442_v61 }
 0x295   :  { %454 = vst.msk [vmem:[#allocation8] sm:$0xff] %vm453_vm15, %v452_v63 }
 0x296   :  { %627 = shalt.err (!%p624_p5)
}
 0x297   :  { %464 = dma.vmem_to_hbm [thread:$0]  %s462_s5, 128, %s788_s9, [#allocation4]  }
 0x298   :  { %640 = dma.done.wait [#allocation4], 128  }
 0x299   :  { %641 = vsyncadd [#allocation4], 4294967168 }
 0x29a   :  { %468 = vsyncpa [#allocation3], 1 }
 0x29b   :  { %469 = vsyncpa [#allocation6], 1 }
 0x29c   :  { %470 = vsyncpa [#allocation4], 1 }

</bundles_post_ra>
